<compile_context>
chip_gen: v6e
topology: v6e:2x2x1
jax: 0.10.0
libtpu: 0.0.40
codegen_flags: <defaults>
</compile_context>

<pallas_src>
import jax
import jax.numpy as jnp
import numpy as np
from jax import lax
from jax.experimental import pallas as pl
from jax.experimental.pallas import tpu as pltpu


# ----------------------------------------------------------------------------
# Fused kernel: (H-upsample matmul) -> banded 3x3 conv + ReLU -> banded 3x3 conv + ReLU
# All activations are lane-dense (rows, W*C); per-image 2D matmuls only.
# ----------------------------------------------------------------------------
def upconvconcat_kernel(uH_ref, x1_ref, x2_ref, wA_ref, bA_ref, wB_ref, bB_ref, o_ref):
    nb = x1_ref.shape[0]
    Hs = x2_ref.shape[1]
    Ho, Ho2 = Hs - 2, Hs - 4
    NA = wA_ref.shape[-1]          # Wo*Cout
    NB = wB_ref.shape[-1]          # Wo2*Cout

    uH = uH_ref[...]               # (Hs, H1)  bf16 row-upsample matrix
    bA = bA_ref[...]               # (1, NA)   f32
    bB = bB_ref[...]               # (1, NB)   f32

    for b in range(nb):            # static unroll: images share one grid step
        # Bilinear x2 upsample: rows via one small matmul (uH @ x1); the column
        # (lane) direction upsample is folded into the banded wA weights.
        x1u = jnp.dot(uH, x1_ref[b],
                      preferred_element_type=jnp.float32).astype(jnp.bfloat16)  # (Hs, W1*Cin)

        # Channel concat with the cropped skip feature: a single lane concat
        # (the channel split itself is folded into the stacked wA weights).
        xcat = jnp.concatenate([x1u, x2_ref[b]], axis=-1)                       # (Hs, KA) bf16

        # First 3x3 VALID conv (conv1 + W-upsample + concat folded in): 3 banded
        # matmuls over the kh row taps -- no im2col patch is ever materialized.
        yA = jnp.zeros((Ho, NA), jnp.float32)
        for kh in range(3):
            yA = yA + jnp.dot(xcat[kh:kh + Ho, :], wA_ref[kh],
                              preferred_element_type=jnp.float32)
        yA = jnp.maximum(yA + bA, 0.0).astype(jnp.bfloat16)                     # (Ho, NA)

        # Second 3x3 VALID conv + bias + ReLU.
        yB = jnp.zeros((Ho2, NB), jnp.float32)
        for kh in range(3):
            yB = yB + jnp.dot(yA[kh:kh + Ho2, :], wB_ref[kh],
                              preferred_element_type=jnp.float32)
        yB = jnp.maximum(yB + bB, 0.0)                                          # (Ho2, NB) f32

        o_ref[b] = yB.astype(o_ref.dtype)


# ----------------------------------------------------------------------------
# Wrapper: layout glue, weight folding into banded lane-space matrices, pallas_call.
# ----------------------------------------------------------------------------
def _bilinear_up2_matrix(n):
    """(n, 2n) matrix U with up[o] = sum_j x[j] * U[j, o].
    PyTorch bilinear scale_factor=2, align_corners=False, edge-clamped."""
    U = np.zeros((n, 2 * n), np.float32)
    for o in range(2 * n):
        i = o // 2
        if o % 2 == 0:
            U[max(i - 1, 0), o] += 0.25
            U[i, o] += 0.75
        else:
            U[i, o] += 0.75
            U[min(i + 1, n - 1), o] += 0.25
    return U


def upconv_concat_forward(x1_nchw, x2_nchw, params, *, batch_tile=None):
    w1, b1, w2a, b2a, w2b, b2b = params   # w1:(Cin,Cout)  w2a:(3,3,Cout+Cskip,Cout) HWIO
    N, Cin, H1, W1 = x1_nchw.shape
    Cskip = x2_nchw.shape[1]
    Cout = w1.shape[1]
    assert Cout + Cskip == w2a.shape[2], "concat channels must match ConvConv in_type"

    Hs, Ws = 2 * H1, 2 * W1             # after upsample; conv1 is 1x1 -> unchanged
    Ho, Wo = Hs - 2, Ws - 2             # first 3x3 VALID conv
    Ho2, Wo2 = Ho - 2, Wo - 2           # second 3x3 VALID conv
    f32 = jnp.float32
    hi = lax.Precision.HIGHEST

    # ---- layout glue: one fused crop+transpose copy per input, then a free
    #      reshape into the lane-dense (N, H, W*C) form; cast to bf16 (fuses). ----
    x1ld = jnp.transpose(x1_nchw, (0, 2, 3, 1)).reshape(N, H1, W1 * Cin)
    r0 = (x2_nchw.shape[2] - Hs) // 2
    c0 = (x2_nchw.shape[3] - Ws) // 2
    x2ld = jnp.transpose(x2_nchw[:, :, r0:r0 + Hs, c0:c0 + Ws],
                         (0, 2, 3, 1)).reshape(N, Hs, Ws * Cskip)
    x1ld = x1ld.astype(jnp.bfloat16)
    x2ld = x2ld.astype(jnp.bfloat16)

    # ---- exact conv1 folding (VALID convs only: all 9 taps always present) ----
    w2a_h = w2a[:, :, :Cout, :].astype(f32)                        # (3,3,Cout,Cout)
    w2a_s = w2a[:, :, Cout:, :].astype(f32)                        # (3,3,Cskip,Cout)
    w_comb = jnp.einsum('ic,hwco->hwio', w1.astype(f32), w2a_h, precision=hi)  # (3,3,Cin,Cout)
    bA = b2a.astype(f32) + jnp.einsum('c,co->o', b1.astype(f32),
                                      w2a_h.sum(axis=(0, 1)), precision=hi)

    # ---- constant banded lane-space weights (built at trace time) ----
    Ucol = _bilinear_up2_matrix(W1)                                 # (W1, Ws)  column upsample
    uHt = jnp.asarray(_bilinear_up2_matrix(H1).T, jnp.bfloat16)     # (Hs, H1)  row upsample
    SA = [np.eye(Ws, Wo, k=-kw, dtype=np.float32) for kw in range(3)]   # kw tap selectors
    SB = [np.eye(Wo, Wo2, k=-kw, dtype=np.float32) for kw in range(3)]
    TA = [Ucol @ SA[kw] for kw in range(3)]                         # column-upsample ∘ kw tap

    def band(P, wt):
        """(P,Q) column map x (I,O) per-tap channel weights -> (P*I, Q*O) banded matrix."""
        Pn, Qn = P.shape
        I, O = wt.shape
        return jnp.einsum('pq,io->piqo', jnp.asarray(P, f32), wt,
                          precision=hi).reshape(Pn * I, Qn * O)

    wA_kh, wB_kh = [], []
    for kh in range(3):
        a1 = sum(band(TA[kw], w_comb[kh, kw]) for kw in range(3))           # (W1*Cin,  Wo*Cout)
        a2 = sum(band(SA[kw], w2a_s[kh, kw]) for kw in range(3))            # (Ws*Cskip, Wo*Cout)
        wA_kh.append(jnp.concatenate([a1, a2], axis=0))
        wB_kh.append(sum(band(SB[kw], w2b[kh, kw].astype(f32)) for kw in range(3)))
    wA = jnp.stack(wA_kh).astype(jnp.bfloat16)       # (3, W1*Cin + Ws*Cskip, Wo*Cout)
    wB = jnp.stack(wB_kh).astype(jnp.bfloat16)       # (3, Wo*Cout, Wo2*Cout)
    bA_l = jnp.tile(bA, Wo).reshape(1, Wo * Cout)                   # lane-tiled biases (f32)
    bB_l = jnp.tile(b2b.astype(f32), Wo2).reshape(1, Wo2 * Cout)

    # ---- batch tiling: one grid step on single-TC chips (v5e/v6e); two steps
    #      only on 2-TensorCore chips (v7x) with an even batch. ----
    if batch_tile is None:
        try:
            kind = jax.devices()[0].device_kind.lower()
        except Exception:
            kind = ""
        two_tc = "v7" in kind
        batch_tile = N // 2 if (two_tc and N >= 2 and N % 2 == 0) else N
    assert N % batch_tile == 0
    nb = batch_tile
    steps = N // nb

    KA, NA = wA.shape[1], wA.shape[2]
    KB, NB = wB.shape[1], wB.shape[2]

    out = pl.pallas_call(
        upconvconcat_kernel,
        out_shape=jax.ShapeDtypeStruct((N, Ho2, Wo2 * Cout), x1_nchw.dtype),
        grid=(steps,),
        in_specs=[
            pl.BlockSpec((Hs, H1), lambda b: (0, 0)),               # uH (resident)
            pl.BlockSpec((nb, H1, W1 * Cin), lambda b: (b, 0, 0)),  # x1 lane-dense
            pl.BlockSpec((nb, Hs, Ws * Cskip), lambda b: (b, 0, 0)),# cropped x2 lane-dense
            pl.BlockSpec((3, KA, NA), lambda b: (0, 0, 0)),         # banded conv-A weights
            pl.BlockSpec((1, NA), lambda b: (0, 0)),
            pl.BlockSpec((3, KB, NB), lambda b: (0, 0, 0)),         # banded conv-B weights
            pl.BlockSpec((1, NB), lambda b: (0, 0)),
        ],
        out_specs=pl.BlockSpec((nb, Ho2, Wo2 * Cout), lambda b: (b, 0, 0)),
        compiler_params=pltpu.CompilerParams(dimension_semantics=("parallel",)),
    )(uHt, x1ld, x2ld, wA, bA_l, wB, bB_l)

    out_nhwc = out.reshape(N, Ho2, Wo2, Cout)
    return jnp.transpose(out_nhwc, (0, 3, 1, 2))                    # NHWC -> NCHW


# ----------------------------------------------------------------------------
# Pure-JAX reference (un-fused) used as a correctness check.
# ----------------------------------------------------------------------------
def _upsample1d_x2_ref(a, axis):
    n = a.shape[axis]
    first = lax.slice_in_dim(a, 0, 1, axis=axis)
    last = lax.slice_in_dim(a, n - 1, n, axis=axis)
    a_m = jnp.concatenate([first, lax.slice_in_dim(a, 0, n - 1, axis=axis)], axis=axis)
    a_p = jnp.concatenate([lax.slice_in_dim(a, 1, n, axis=axis), last], axis=axis)
    even = 0.25 * a_m + 0.75 * a
    odd = 0.75 * a + 0.25 * a_p
    stacked = jnp.stack([even, odd], axis=axis + 1)
    shp = list(a.shape)
    shp[axis] = 2 * n
    return stacked.reshape(shp)


def reference_forward(x1_nchw, x2_nchw, params):
    w1, b1, w2a, b2a, w2b, b2b = params
    hi = lax.Precision.HIGHEST
    x1 = jnp.transpose(x1_nchw, (0, 2, 3, 1))
    x2 = jnp.transpose(x2_nchw, (0, 2, 3, 1))
    x1u = _upsample1d_x2_ref(_upsample1d_x2_ref(x1, 1), 2)
    h = jnp.einsum('nhwi,io->nhwo', x1u, w1, precision=hi) + b1
    Hs, Ws = x1u.shape[1], x1u.shape[2]
    r0 = (x2.shape[1] - Hs) // 2
    c0 = (x2.shape[2] - Ws) // 2
    x2c = x2[:, r0:r0 + Hs, c0:c0 + Ws, :]
    cat = jnp.concatenate([h, x2c], axis=-1)
    y = lax.conv_general_dilated(cat, w2a, (1, 1), 'VALID',
                                 dimension_numbers=('NHWC', 'HWIO', 'NHWC'),
                                 precision=hi)
    y = jnp.maximum(y + b2a, 0.0)
    z = lax.conv_general_dilated(y, w2b, (1, 1), 'VALID',
                                 dimension_numbers=('NHWC', 'HWIO', 'NHWC'),
                                 precision=hi)
    z = jnp.maximum(z + b2b, 0.0)
    return jnp.transpose(z, (0, 3, 1, 2))


def init_params(key, cin, cout, cskip, dtype=jnp.float32):
    # Synthetic deterministic parameters (e2cnn's equivariant weight basis is an
    # init-time parametrization only; plain conv weights are used here).
    ks = jax.random.split(key, 6)
    w1 = 0.1 * jax.random.normal(ks[0], (cin, cout), dtype)                   # 1x1 conv (Cin, Cout)
    b1 = 0.1 * jax.random.normal(ks[1], (cout,), dtype)
    w2a = 0.1 * jax.random.normal(ks[2], (3, 3, cout + cskip, cout), dtype)   # HWIO
    b2a = 0.1 * jax.random.normal(ks[3], (cout,), dtype)
    w2b = 0.1 * jax.random.normal(ks[4], (3, 3, cout, cout), dtype)           # HWIO
    b2b = 0.1 * jax.random.normal(ks[5], (cout,), dtype)
    return (w1, b1, w2a, b2a, w2b, b2b)


if __name__ == "__main__":
    N, Cin, Cout, Cskip = 2, 8, 4, 4
    key = jax.random.PRNGKey(0)
    kx1, kx2, kp = jax.random.split(key, 3)

    # x1: low-res decoder feature (NCHW); x2: higher-res skip feature (NCHW).
    x1 = jax.random.normal(kx1, (N, Cin, 8, 8), jnp.float32)
    x2 = jax.random.normal(kx2, (N, Cskip, 20, 20), jnp.float32)
    params = init_params(kp, Cin, Cout, Cskip)

    fwd = jax.jit(upconv_concat_forward)
    out = jax.block_until_ready(fwd(x1, x2, params))

    # upsample: 8 -> 16; conv1 (1x1): 16; two 3x3 VALID convs: 16 -> 14 -> 12
    assert out.shape == (N, Cout, 12, 12), out.shape
    assert bool(jnp.all(out >= 0.0))          # final ReLU
    assert bool(jnp.all(jnp.isfinite(out)))

    ref = jax.block_until_ready(reference_forward(x1, x2, params))
    assert bool(jnp.allclose(out, ref, rtol=5e-2, atol=5e-2)), \
        float(jnp.max(jnp.abs(out - ref)))

    print("KERNEL_OK")
</pallas_src>

<mosaic_0001>
module attributes {stable_mosaic.version = 11 : i64} {
  func.func @upconvconcat_kernel(%arg0: i32, %arg1: memref<16x8xbf16, #tpu.memory_space<vmem>>, %arg2: memref<2x8x64xbf16, #tpu.memory_space<vmem>>, %arg3: memref<2x16x64xbf16, #tpu.memory_space<vmem>>, %arg4: memref<3x128x56xbf16, #tpu.memory_space<vmem>>, %arg5: memref<1x56xf32, #tpu.memory_space<vmem>>, %arg6: memref<3x56x48xbf16, #tpu.memory_space<vmem>>, %arg7: memref<1x48xf32, #tpu.memory_space<vmem>>, %arg8: memref<2x12x48xf32, #tpu.memory_space<vmem>>) attributes {dimension_semantics = [#tpu.dimension_semantics<parallel>], iteration_bounds = array<i64: 1>, scalar_prefetch = 0 : i64, scratch_operands = 0 : i64, tpu.core_type = #tpu.core_type<tc>, window_params = [{pipeline_mode = #tpu.pipeline_mode<synchronous>, transform_indices = @transform_0, window_bounds = array<i64: 16, 8>}, {transform_indices = @transform_1, window_bounds = array<i64: 2, 8, 64>}, {transform_indices = @transform_2, window_bounds = array<i64: 2, 16, 64>}, {pipeline_mode = #tpu.pipeline_mode<synchronous>, transform_indices = @transform_3, window_bounds = array<i64: 3, 128, 56>}, {pipeline_mode = #tpu.pipeline_mode<synchronous>, transform_indices = @transform_4, window_bounds = array<i64: 1, 56>}, {pipeline_mode = #tpu.pipeline_mode<synchronous>, transform_indices = @transform_5, window_bounds = array<i64: 3, 56, 48>}, {pipeline_mode = #tpu.pipeline_mode<synchronous>, transform_indices = @transform_6, window_bounds = array<i64: 1, 48>}, {transform_indices = @transform_7, window_bounds = array<i64: 2, 12, 48>}]} {
    %c0 = arith.constant 0 : index
    %c0_0 = arith.constant 0 : index
    %0 = vector.load %arg1[%c0, %c0_0] : memref<16x8xbf16, #tpu.memory_space<vmem>>, vector<16x8xbf16>
    %c0_1 = arith.constant 0 : index
    %c0_2 = arith.constant 0 : index
    %1 = vector.load %arg5[%c0_1, %c0_2] : memref<1x56xf32, #tpu.memory_space<vmem>>, vector<1x56xf32>
    %c0_3 = arith.constant 0 : index
    %c0_4 = arith.constant 0 : index
    %2 = vector.load %arg7[%c0_3, %c0_4] : memref<1x48xf32, #tpu.memory_space<vmem>>, vector<1x48xf32>
    %c0_5 = arith.constant 0 : index
    %c0_6 = arith.constant 0 : index
    %c0_7 = arith.constant 0 : index
    %3 = vector.load %arg2[%c0_5, %c0_6, %c0_7] : memref<2x8x64xbf16, #tpu.memory_space<vmem>>, vector<1x8x64xbf16>
    %4 = vector.shape_cast %3 : vector<1x8x64xbf16> to vector<8x64xbf16>
    %cst = arith.constant dense<0.000000e+00> : vector<16x64xf32>
    %5 = tpu.matmul %0, %4, %cst {dimension_numbers = #tpu.dot_dimension_numbers<[1], [0], [0], [1], [0, 0, 1, 1], [], []>} : vector<16x8xbf16>, vector<8x64xbf16>, vector<16x64xf32> -> vector<16x64xf32>
    %6 = arith.truncf %5 : vector<16x64xf32> to vector<16x64xbf16>
    %c0_8 = arith.constant 0 : index
    %c0_9 = arith.constant 0 : index
    %c0_10 = arith.constant 0 : index
    %7 = vector.load %arg3[%c0_8, %c0_9, %c0_10] : memref<2x16x64xbf16, #tpu.memory_space<vmem>>, vector<1x16x64xbf16>
    %8 = vector.shape_cast %7 : vector<1x16x64xbf16> to vector<16x64xbf16>
    %9 = tpu.concatenate %6, %8 in 1 : vector<16x64xbf16>, vector<16x64xbf16> -> vector<16x128xbf16>
    %cst_11 = arith.constant 0.000000e+00 : f32
    %10 = vector.broadcast %cst_11 : f32 to vector<14x56xf32>
    %11 = vector.extract_strided_slice %9 {offsets = [0, 0], sizes = [14, 128], strides = [1, 1]} : vector<16x128xbf16> to vector<14x128xbf16>
    %c0_12 = arith.constant 0 : index
    %c0_13 = arith.constant 0 : index
    %c0_14 = arith.constant 0 : index
    %12 = vector.load %arg4[%c0_12, %c0_13, %c0_14] : memref<3x128x56xbf16, #tpu.memory_space<vmem>>, vector<1x128x56xbf16>
    %13 = vector.shape_cast %12 : vector<1x128x56xbf16> to vector<128x56xbf16>
    %cst_15 = arith.constant dense<0.000000e+00> : vector<14x56xf32>
    %14 = tpu.matmul %11, %13, %cst_15 {dimension_numbers = #tpu.dot_dimension_numbers<[1], [0], [0], [1], [0, 0, 1, 1], [], []>} : vector<14x128xbf16>, vector<128x56xbf16>, vector<14x56xf32> -> vector<14x56xf32>
    %15 = arith.addf %10, %14 : vector<14x56xf32>
    %16 = vector.extract_strided_slice %9 {offsets = [1, 0], sizes = [14, 128], strides = [1, 1]} : vector<16x128xbf16> to vector<14x128xbf16>
    %c1 = arith.constant 1 : index
    %c0_16 = arith.constant 0 : index
    %c0_17 = arith.constant 0 : index
    %17 = vector.load %arg4[%c1, %c0_16, %c0_17] : memref<3x128x56xbf16, #tpu.memory_space<vmem>>, vector<1x128x56xbf16>
    %18 = vector.shape_cast %17 : vector<1x128x56xbf16> to vector<128x56xbf16>
    %cst_18 = arith.constant dense<0.000000e+00> : vector<14x56xf32>
    %19 = tpu.matmul %16, %18, %cst_18 {dimension_numbers = #tpu.dot_dimension_numbers<[1], [0], [0], [1], [0, 0, 1, 1], [], []>} : vector<14x128xbf16>, vector<128x56xbf16>, vector<14x56xf32> -> vector<14x56xf32>
    %20 = arith.addf %15, %19 : vector<14x56xf32>
    %21 = vector.extract_strided_slice %9 {offsets = [2, 0], sizes = [14, 128], strides = [1, 1]} : vector<16x128xbf16> to vector<14x128xbf16>
    %c2 = arith.constant 2 : index
    %c0_19 = arith.constant 0 : index
    %c0_20 = arith.constant 0 : index
    %22 = vector.load %arg4[%c2, %c0_19, %c0_20] : memref<3x128x56xbf16, #tpu.memory_space<vmem>>, vector<1x128x56xbf16>
    %23 = vector.shape_cast %22 : vector<1x128x56xbf16> to vector<128x56xbf16>
    %cst_21 = arith.constant dense<0.000000e+00> : vector<14x56xf32>
    %24 = tpu.matmul %21, %23, %cst_21 {dimension_numbers = #tpu.dot_dimension_numbers<[1], [0], [0], [1], [0, 0, 1, 1], [], []>} : vector<14x128xbf16>, vector<128x56xbf16>, vector<14x56xf32> -> vector<14x56xf32>
    %25 = arith.addf %20, %24 : vector<14x56xf32>
    %26 = vector.broadcast %1 : vector<1x56xf32> to vector<14x56xf32>
    %27 = arith.addf %25, %26 : vector<14x56xf32>
    %cst_22 = arith.constant 0.000000e+00 : f32
    %28 = vector.broadcast %cst_22 : f32 to vector<14x56xf32>
    %29 = arith.maximumf %27, %28 : vector<14x56xf32>
    %30 = arith.truncf %29 : vector<14x56xf32> to vector<14x56xbf16>
    %cst_23 = arith.constant 0.000000e+00 : f32
    %31 = vector.broadcast %cst_23 : f32 to vector<12x48xf32>
    %32 = vector.extract_strided_slice %30 {offsets = [0, 0], sizes = [12, 56], strides = [1, 1]} : vector<14x56xbf16> to vector<12x56xbf16>
    %c0_24 = arith.constant 0 : index
    %c0_25 = arith.constant 0 : index
    %c0_26 = arith.constant 0 : index
    %33 = vector.load %arg6[%c0_24, %c0_25, %c0_26] : memref<3x56x48xbf16, #tpu.memory_space<vmem>>, vector<1x56x48xbf16>
    %34 = vector.shape_cast %33 : vector<1x56x48xbf16> to vector<56x48xbf16>
    %cst_27 = arith.constant dense<0.000000e+00> : vector<12x48xf32>
    %35 = tpu.matmul %32, %34, %cst_27 {dimension_numbers = #tpu.dot_dimension_numbers<[1], [0], [0], [1], [0, 0, 1, 1], [], []>} : vector<12x56xbf16>, vector<56x48xbf16>, vector<12x48xf32> -> vector<12x48xf32>
    %36 = arith.addf %31, %35 : vector<12x48xf32>
    %37 = vector.extract_strided_slice %30 {offsets = [1, 0], sizes = [12, 56], strides = [1, 1]} : vector<14x56xbf16> to vector<12x56xbf16>
    %c1_28 = arith.constant 1 : index
    %c0_29 = arith.constant 0 : index
    %c0_30 = arith.constant 0 : index
    %38 = vector.load %arg6[%c1_28, %c0_29, %c0_30] : memref<3x56x48xbf16, #tpu.memory_space<vmem>>, vector<1x56x48xbf16>
    %39 = vector.shape_cast %38 : vector<1x56x48xbf16> to vector<56x48xbf16>
    %cst_31 = arith.constant dense<0.000000e+00> : vector<12x48xf32>
    %40 = tpu.matmul %37, %39, %cst_31 {dimension_numbers = #tpu.dot_dimension_numbers<[1], [0], [0], [1], [0, 0, 1, 1], [], []>} : vector<12x56xbf16>, vector<56x48xbf16>, vector<12x48xf32> -> vector<12x48xf32>
    %41 = arith.addf %36, %40 : vector<12x48xf32>
    %42 = vector.extract_strided_slice %30 {offsets = [2, 0], sizes = [12, 56], strides = [1, 1]} : vector<14x56xbf16> to vector<12x56xbf16>
    %c2_32 = arith.constant 2 : index
    %c0_33 = arith.constant 0 : index
    %c0_34 = arith.constant 0 : index
    %43 = vector.load %arg6[%c2_32, %c0_33, %c0_34] : memref<3x56x48xbf16, #tpu.memory_space<vmem>>, vector<1x56x48xbf16>
    %44 = vector.shape_cast %43 : vector<1x56x48xbf16> to vector<56x48xbf16>
    %cst_35 = arith.constant dense<0.000000e+00> : vector<12x48xf32>
    %45 = tpu.matmul %42, %44, %cst_35 {dimension_numbers = #tpu.dot_dimension_numbers<[1], [0], [0], [1], [0, 0, 1, 1], [], []>} : vector<12x56xbf16>, vector<56x48xbf16>, vector<12x48xf32> -> vector<12x48xf32>
    %46 = arith.addf %41, %45 : vector<12x48xf32>
    %47 = vector.broadcast %2 : vector<1x48xf32> to vector<12x48xf32>
    %48 = arith.addf %46, %47 : vector<12x48xf32>
    %cst_36 = arith.constant 0.000000e+00 : f32
    %49 = vector.broadcast %cst_36 : f32 to vector<12x48xf32>
    %50 = arith.maximumf %48, %49 : vector<12x48xf32>
    %c0_37 = arith.constant 0 : index
    %c0_38 = arith.constant 0 : index
    %c0_39 = arith.constant 0 : index
    %51 = vector.load %arg8[%c0_37, %c0_38, %c0_39] : memref<2x12x48xf32, #tpu.memory_space<vmem>>, vector<1x12x48xf32>
    %52 = vector.shape_cast %51 : vector<1x12x48xf32> to vector<12x48xf32>
    %53 = vector.shape_cast %50 : vector<12x48xf32> to vector<1x12x48xf32>
    tpu.vector_store %arg8[%c0_37, %c0_38, %c0_39], %53 {strides = array<i32>} : memref<2x12x48xf32, #tpu.memory_space<vmem>>, vector<1x12x48xf32>,
    %c1_40 = arith.constant 1 : index
    %c0_41 = arith.constant 0 : index
    %c0_42 = arith.constant 0 : index
    %54 = vector.load %arg2[%c1_40, %c0_41, %c0_42] : memref<2x8x64xbf16, #tpu.memory_space<vmem>>, vector<1x8x64xbf16>
    %55 = vector.shape_cast %54 : vector<1x8x64xbf16> to vector<8x64xbf16>
    %cst_43 = arith.constant dense<0.000000e+00> : vector<16x64xf32>
    %56 = tpu.matmul %0, %55, %cst_43 {dimension_numbers = #tpu.dot_dimension_numbers<[1], [0], [0], [1], [0, 0, 1, 1], [], []>} : vector<16x8xbf16>, vector<8x64xbf16>, vector<16x64xf32> -> vector<16x64xf32>
    %57 = arith.truncf %56 : vector<16x64xf32> to vector<16x64xbf16>
    %c1_44 = arith.constant 1 : index
    %c0_45 = arith.constant 0 : index
    %c0_46 = arith.constant 0 : index
    %58 = vector.load %arg3[%c1_44, %c0_45, %c0_46] : memref<2x16x64xbf16, #tpu.memory_space<vmem>>, vector<1x16x64xbf16>
    %59 = vector.shape_cast %58 : vector<1x16x64xbf16> to vector<16x64xbf16>
    %60 = tpu.concatenate %57, %59 in 1 : vector<16x64xbf16>, vector<16x64xbf16> -> vector<16x128xbf16>
    %cst_47 = arith.constant 0.000000e+00 : f32
    %61 = vector.broadcast %cst_47 : f32 to vector<14x56xf32>
    %62 = vector.extract_strided_slice %60 {offsets = [0, 0], sizes = [14, 128], strides = [1, 1]} : vector<16x128xbf16> to vector<14x128xbf16>
    %c0_48 = arith.constant 0 : index
    %c0_49 = arith.constant 0 : index
    %c0_50 = arith.constant 0 : index
    %63 = vector.load %arg4[%c0_48, %c0_49, %c0_50] : memref<3x128x56xbf16, #tpu.memory_space<vmem>>, vector<1x128x56xbf16>
    %64 = vector.shape_cast %63 : vector<1x128x56xbf16> to vector<128x56xbf16>
    %cst_51 = arith.constant dense<0.000000e+00> : vector<14x56xf32>
    %65 = tpu.matmul %62, %64, %cst_51 {dimension_numbers = #tpu.dot_dimension_numbers<[1], [0], [0], [1], [0, 0, 1, 1], [], []>} : vector<14x128xbf16>, vector<128x56xbf16>, vector<14x56xf32> -> vector<14x56xf32>
    %66 = arith.addf %61, %65 : vector<14x56xf32>
    %67 = vector.extract_strided_slice %60 {offsets = [1, 0], sizes = [14, 128], strides = [1, 1]} : vector<16x128xbf16> to vector<14x128xbf16>
    %c1_52 = arith.constant 1 : index
    %c0_53 = arith.constant 0 : index
    %c0_54 = arith.constant 0 : index
    %68 = vector.load %arg4[%c1_52, %c0_53, %c0_54] : memref<3x128x56xbf16, #tpu.memory_space<vmem>>, vector<1x128x56xbf16>
    %69 = vector.shape_cast %68 : vector<1x128x56xbf16> to vector<128x56xbf16>
    %cst_55 = arith.constant dense<0.000000e+00> : vector<14x56xf32>
    %70 = tpu.matmul %67, %69, %cst_55 {dimension_numbers = #tpu.dot_dimension_numbers<[1], [0], [0], [1], [0, 0, 1, 1], [], []>} : vector<14x128xbf16>, vector<128x56xbf16>, vector<14x56xf32> -> vector<14x56xf32>
    %71 = arith.addf %66, %70 : vector<14x56xf32>
    %72 = vector.extract_strided_slice %60 {offsets = [2, 0], sizes = [14, 128], strides = [1, 1]} : vector<16x128xbf16> to vector<14x128xbf16>
    %c2_56 = arith.constant 2 : index
    %c0_57 = arith.constant 0 : index
    %c0_58 = arith.constant 0 : index
    %73 = vector.load %arg4[%c2_56, %c0_57, %c0_58] : memref<3x128x56xbf16, #tpu.memory_space<vmem>>, vector<1x128x56xbf16>
    %74 = vector.shape_cast %73 : vector<1x128x56xbf16> to vector<128x56xbf16>
    %cst_59 = arith.constant dense<0.000000e+00> : vector<14x56xf32>
    %75 = tpu.matmul %72, %74, %cst_59 {dimension_numbers = #tpu.dot_dimension_numbers<[1], [0], [0], [1], [0, 0, 1, 1], [], []>} : vector<14x128xbf16>, vector<128x56xbf16>, vector<14x56xf32> -> vector<14x56xf32>
    %76 = arith.addf %71, %75 : vector<14x56xf32>
    %77 = vector.broadcast %1 : vector<1x56xf32> to vector<14x56xf32>
    %78 = arith.addf %76, %77 : vector<14x56xf32>
    %cst_60 = arith.constant 0.000000e+00 : f32
    %79 = vector.broadcast %cst_60 : f32 to vector<14x56xf32>
    %80 = arith.maximumf %78, %79 : vector<14x56xf32>
    %81 = arith.truncf %80 : vector<14x56xf32> to vector<14x56xbf16>
    %cst_61 = arith.constant 0.000000e+00 : f32
    %82 = vector.broadcast %cst_61 : f32 to vector<12x48xf32>
    %83 = vector.extract_strided_slice %81 {offsets = [0, 0], sizes = [12, 56], strides = [1, 1]} : vector<14x56xbf16> to vector<12x56xbf16>
    %c0_62 = arith.constant 0 : index
    %c0_63 = arith.constant 0 : index
    %c0_64 = arith.constant 0 : index
    %84 = vector.load %arg6[%c0_62, %c0_63, %c0_64] : memref<3x56x48xbf16, #tpu.memory_space<vmem>>, vector<1x56x48xbf16>
    %85 = vector.shape_cast %84 : vector<1x56x48xbf16> to vector<56x48xbf16>
    %cst_65 = arith.constant dense<0.000000e+00> : vector<12x48xf32>
    %86 = tpu.matmul %83, %85, %cst_65 {dimension_numbers = #tpu.dot_dimension_numbers<[1], [0], [0], [1], [0, 0, 1, 1], [], []>} : vector<12x56xbf16>, vector<56x48xbf16>, vector<12x48xf32> -> vector<12x48xf32>
    %87 = arith.addf %82, %86 : vector<12x48xf32>
    %88 = vector.extract_strided_slice %81 {offsets = [1, 0], sizes = [12, 56], strides = [1, 1]} : vector<14x56xbf16> to vector<12x56xbf16>
    %c1_66 = arith.constant 1 : index
    %c0_67 = arith.constant 0 : index
    %c0_68 = arith.constant 0 : index
    %89 = vector.load %arg6[%c1_66, %c0_67, %c0_68] : memref<3x56x48xbf16, #tpu.memory_space<vmem>>, vector<1x56x48xbf16>
    %90 = vector.shape_cast %89 : vector<1x56x48xbf16> to vector<56x48xbf16>
    %cst_69 = arith.constant dense<0.000000e+00> : vector<12x48xf32>
    %91 = tpu.matmul %88, %90, %cst_69 {dimension_numbers = #tpu.dot_dimension_numbers<[1], [0], [0], [1], [0, 0, 1, 1], [], []>} : vector<12x56xbf16>, vector<56x48xbf16>, vector<12x48xf32> -> vector<12x48xf32>
    %92 = arith.addf %87, %91 : vector<12x48xf32>
    %93 = vector.extract_strided_slice %81 {offsets = [2, 0], sizes = [12, 56], strides = [1, 1]} : vector<14x56xbf16> to vector<12x56xbf16>
    %c2_70 = arith.constant 2 : index
    %c0_71 = arith.constant 0 : index
    %c0_72 = arith.constant 0 : index
    %94 = vector.load %arg6[%c2_70, %c0_71, %c0_72] : memref<3x56x48xbf16, #tpu.memory_space<vmem>>, vector<1x56x48xbf16>
    %95 = vector.shape_cast %94 : vector<1x56x48xbf16> to vector<56x48xbf16>
    %cst_73 = arith.constant dense<0.000000e+00> : vector<12x48xf32>
    %96 = tpu.matmul %93, %95, %cst_73 {dimension_numbers = #tpu.dot_dimension_numbers<[1], [0], [0], [1], [0, 0, 1, 1], [], []>} : vector<12x56xbf16>, vector<56x48xbf16>, vector<12x48xf32> -> vector<12x48xf32>
    %97 = arith.addf %92, %96 : vector<12x48xf32>
    %98 = vector.broadcast %2 : vector<1x48xf32> to vector<12x48xf32>
    %99 = arith.addf %97, %98 : vector<12x48xf32>
    %cst_74 = arith.constant 0.000000e+00 : f32
    %100 = vector.broadcast %cst_74 : f32 to vector<12x48xf32>
    %101 = arith.maximumf %99, %100 : vector<12x48xf32>
    %c1_75 = arith.constant 1 : index
    %c0_76 = arith.constant 0 : index
    %c0_77 = arith.constant 0 : index
    %102 = vector.load %arg8[%c1_75, %c0_76, %c0_77] : memref<2x12x48xf32, #tpu.memory_space<vmem>>, vector<1x12x48xf32>
    %103 = vector.shape_cast %102 : vector<1x12x48xf32> to vector<12x48xf32>
    %104 = vector.shape_cast %101 : vector<12x48xf32> to vector<1x12x48xf32>
    tpu.vector_store %arg8[%c1_75, %c0_76, %c0_77], %104 {strides = array<i32>} : memref<2x12x48xf32, #tpu.memory_space<vmem>>, vector<1x12x48xf32>,
    return
  }
  func.func @transform_0(%arg0: i32) -> (i32, i32) {
    %c0_i32 = arith.constant 0 : i32
    %c0_i32_0 = arith.constant 0 : i32
    %c0_i32_1 = arith.constant 0 : i32
    return %c0_i32, %c0_i32_0 : i32, i32
  }
  func.func @transform_1(%arg0: i32) -> (i32, i32, i32) {
    %c0_i32 = arith.constant 0 : i32
    %c0_i32_0 = arith.constant 0 : i32
    %c0_i32_1 = arith.constant 0 : i32
    return %arg0, %c0_i32, %c0_i32_0 : i32, i32, i32
  }
  func.func @transform_2(%arg0: i32) -> (i32, i32, i32) {
    %c0_i32 = arith.constant 0 : i32
    %c0_i32_0 = arith.constant 0 : i32
    %c0_i32_1 = arith.constant 0 : i32
    return %arg0, %c0_i32, %c0_i32_0 : i32, i32, i32
  }
  func.func @transform_3(%arg0: i32) -> (i32, i32, i32) {
    %c0_i32 = arith.constant 0 : i32
    %c0_i32_0 = arith.constant 0 : i32
    %c0_i32_1 = arith.constant 0 : i32
    %c0_i32_2 = arith.constant 0 : i32
    return %c0_i32, %c0_i32_0, %c0_i32_1 : i32, i32, i32
  }
  func.func @transform_4(%arg0: i32) -> (i32, i32) {
    %c0_i32 = arith.constant 0 : i32
    %c0_i32_0 = arith.constant 0 : i32
    %c0_i32_1 = arith.constant 0 : i32
    return %c0_i32, %c0_i32_0 : i32, i32
  }
  func.func @transform_5(%arg0: i32) -> (i32, i32, i32) {
    %c0_i32 = arith.constant 0 : i32
    %c0_i32_0 = arith.constant 0 : i32
    %c0_i32_1 = arith.constant 0 : i32
    %c0_i32_2 = arith.constant 0 : i32
    return %c0_i32, %c0_i32_0, %c0_i32_1 : i32, i32, i32
  }
  func.func @transform_6(%arg0: i32) -> (i32, i32) {
    %c0_i32 = arith.constant 0 : i32
    %c0_i32_0 = arith.constant 0 : i32
    %c0_i32_1 = arith.constant 0 : i32
    return %c0_i32, %c0_i32_0 : i32, i32
  }
  func.func @transform_7(%arg0: i32) -> (i32, i32, i32) {
    %c0_i32 = arith.constant 0 : i32
    %c0_i32_0 = arith.constant 0 : i32
    %c0_i32_1 = arith.constant 0 : i32
    return %arg0, %c0_i32, %c0_i32_0 : i32, i32, i32
  }
}

</mosaic_0001>

<bundles_post_ra>
// kernel: tile.13
= control target key start
LH: loop header
LB: loop body
LE: loop exit
PB: predicated region body
PF: predicated region fallthrough
CT: control target
= control target key end

     0   :  { %s28_s0 = inlined_call_operand.vmem [shape: f32[4], index: 0, kind: input, shape index: {}]   ;;  %s29_s1 = inlined_call_operand.vmem [shape: f32[14,4], index: 1, kind: output, shape index: {}]  }
   0x1   :  { %v4_v0 = vld [vmem:[%s28_s0] ss:$0 sm:$0xff] }
   0x2   :  { %5 = vst [vmem:[%s29_s1] sm:$0xff] %v4_v0  ;;  %8 = vst [vmem:[%s29_s1 + $0x8] sm:$0xff] %v4_v0 }

// kernel: tile.14
= control target key start
LH: loop header
LB: loop body
LE: loop exit
PB: predicated region body
PF: predicated region fallthrough
CT: control target
= control target key end

     0   :  { %s117_s10 = smov 52   ;;  %s118_s11 = smov 44   ;;  %vm3_vm0 = vcmask 31744   ;;  %vm9_vm1 = vcmask 458144   ;;  %vm15_vm2 = vcmask 425344   ;;  %vm21_vm3 = vcmask 392544   ;;  %s185_s0 = inlined_call_operand.vmem [shape: f32[14,4], index: 0, kind: input, shape index: {}]   ;;  %s186_s1 = inlined_call_operand.vmem [shape: f32[1,56], index: 1, kind: output, shape index: {}]  }
   0x1   :  { %v91_v0 = vld [vmem:[%s185_s0 + $0xd] sm:$0x1]   ;;  %v93_v1 = vld [vmem:[%s185_s0 + $0xb] sm:$0x1]   ;;  %v92_v2 = vld [vmem:[%s185_s0 + $0xc] sm:$0x1]  }
   0x2   :  { %7 = vrot.lane.b32.xlu0 %v91_v0, %s117_s10  ;;  %19 = vrot.lane.b32.xlu1 %v93_v1, %s118_s11  ;;  %v94_v3 = vld [vmem:[%s185_s0 + $0xa] sm:$0x1]   ;;  %s119_s16 = smov 48   ;;  %s120_s17 = smov 40   ;;  %v95_v4 = vld [vmem:[%s185_s0 + $0x9] sm:$0x1]  }
   0x3   :  { %v96_v5 = vld [vmem:[%s185_s0 + $0x8] sm:$0x1]   ;;  %v2_v6 = vld [vmem:[%s185_s0] sm:$0x1]   ;;  %s121_s24 = smov 36   ;;  %s122_s25 = smov 32  }
   0x4   :  { %4 = vst.msk [vmem:[#allocation0] sm:$0x1] %vm3_vm0, %v2_v6   ;;  %v97_v7 = vld [vmem:[%s185_s0 + $0x7] sm:$0x1]   ;;  %v98_v8 = vld [vmem:[%s185_s0 + $0x6] sm:$0x1]  }
   0x5   :  { %s123_s30 = smov 28   ;;  %s124_s2 = smov 24   ;;  %v99_v9 = vld [vmem:[%s185_s0 + $0x5] sm:$0x1]   ;;  %v100_v10 = vld [vmem:[%s185_s0 + $0x4] sm:$0x1]  }
   0x6   :  { %13 = vrot.lane.b32.xlu0 %v92_v2, %s119_s16  ;;  %25 = vrot.lane.b32.xlu1 %v94_v3, %s120_s17  ;;  %s125_s7 = smov 20   ;;  %s126_s8 = smov 16   ;;  %v101_v11 = vld [vmem:[%s185_s0 + $0x3] sm:$0x1]   ;;  %v102_v12 = vld [vmem:[%s185_s0 + $0x2] sm:$0x1]  }
   0x7   :  { %s127_s13 = smov 12   ;;  %s128_s14 = smov 8   ;;  %v103_v13 = vld [vmem:[%s185_s0 + $0x1] sm:$0x1]   ;;  %vm27_vm4 = vcmask 359744   ;;  %vm33_vm5 = vcmask 326944  }
   0x8   :  { %s129_s0 = smov 4   ;;  %vm39_vm6 = vcmask 294144   ;;  %vm45_vm7 = vcmask 261344   ;;  %vm51_vm8 = vcmask 228544   ;;  %vm57_vm9 = vcmask 195744  }
   0x9   :  { %vm63_vm10 = vcmask 162944   ;;  %vm69_vm11 = vcmask 130144   ;;  %vm75_vm12 = vcmask 97344   ;;  %vm81_vm13 = vcmask 64544  }
   0xa   :  { %31 = vrot.lane.b32.xlu0 %v95_v4, %s121_s24  ;;  %37 = vrot.lane.b32.xlu1 %v96_v5, %s122_s25 }
   0xe   :  { %43 = vrot.lane.b32.xlu0 %v97_v7, %s123_s30  ;;  %49 = vrot.lane.b32.xlu1 %v98_v8, %s124_s2 }
  0x12   :  { %55 = vrot.lane.b32.xlu0 %v99_v9, %s125_s7  ;;  %61 = vrot.lane.b32.xlu1 %v100_v10, %s126_s8 }
  0x16   :  { %67 = vrot.lane.b32.xlu0 %v101_v11, %s127_s13  ;;  %73 = vrot.lane.b32.xlu1 %v102_v12, %s128_s14 }
  0x1a   :  { %79 = vrot.lane.b32.xlu0 %v103_v13, %s129_s0 }
  0x74   :  { %v8_v14 = vpop.permute.xlu0 %7   ;;  %v20_v15 = vpop.permute.xlu1 %19  }
  0x75   :  { %10 = vst.msk [vmem:[#allocation0] sm:$0x1] %vm9_vm1, %v8_v14  }
  0x78   :  { %v14_v16 = vpop.permute.xlu0 %13   ;;  %v26_v17 = vpop.permute.xlu1 %25  }
  0x79   :  { %16 = vst.msk [vmem:[#allocation0] sm:$0x1] %vm15_vm2, %v14_v16  }
  0x7a   :  { %22 = vst.msk [vmem:[#allocation0] sm:$0x1] %vm21_vm3, %v20_v15  }
  0x7b   :  { %28 = vst.msk [vmem:[#allocation0] sm:$0x1] %vm27_vm4, %v26_v17  }
  0x7c   :  { %v32_v18 = vpop.permute.xlu0 %31   ;;  %v38_v19 = vpop.permute.xlu1 %37  }
  0x7d   :  { %34 = vst.msk [vmem:[#allocation0] sm:$0x1] %vm33_vm5, %v32_v18  }
  0x7e   :  { %40 = vst.msk [vmem:[#allocation0] sm:$0x1] %vm39_vm6, %v38_v19  }
  0x80   :  { %v44_v20 = vpop.permute.xlu0 %43   ;;  %v50_v21 = vpop.permute.xlu1 %49  }
  0x81   :  { %46 = vst.msk [vmem:[#allocation0] sm:$0x1] %vm45_vm7, %v44_v20  }
  0x82   :  { %52 = vst.msk [vmem:[#allocation0] sm:$0x1] %vm51_vm8, %v50_v21  }
  0x84   :  { %v56_v22 = vpop.permute.xlu0 %55   ;;  %v62_v23 = vpop.permute.xlu1 %61  }
  0x85   :  { %58 = vst.msk [vmem:[#allocation0] sm:$0x1] %vm57_vm9, %v56_v22  }
  0x86   :  { %64 = vst.msk [vmem:[#allocation0] sm:$0x1] %vm63_vm10, %v62_v23  }
  0x88   :  { %v68_v24 = vpop.permute.xlu0 %67   ;;  %v74_v25 = vpop.permute.xlu1 %73  }
  0x89   :  { %70 = vst.msk [vmem:[#allocation0] sm:$0x1] %vm69_vm11, %v68_v24  }
  0x8a   :  { %76 = vst.msk [vmem:[#allocation0] sm:$0x1] %vm75_vm12, %v74_v25  }
  0x8c   :  { %v80_v26 = vpop.permute.xlu0 %79  }
  0x8d   :  { %82 = vst.msk [vmem:[#allocation0] sm:$0x1] %vm81_vm13, %v80_v26  }
  0x94   :  { %v87_v27 = vld [vmem:[#allocation0] sm:$0x1] }
  0x95   :  { %90 = vst [vmem:[%s186_s1] sm:$0x1] %v87_v27 }

// kernel: tile.18
= control target key start
LH: loop header
LB: loop body
LE: loop exit
PB: predicated region body
PF: predicated region fallthrough
CT: control target
= control target key end

     0   :  { %s28_s0 = inlined_call_operand.vmem [shape: f32[4], index: 0, kind: input, shape index: {}]   ;;  %s29_s1 = inlined_call_operand.vmem [shape: f32[12,4], index: 1, kind: output, shape index: {}]  }
   0x1   :  { %v4_v0 = vld [vmem:[%s28_s0] ss:$0 sm:$0xff] }
   0x2   :  { %5 = vst [vmem:[%s29_s1] sm:$0xff] %v4_v0  ;;  %8 = vst [vmem:[%s29_s1 + $0x8] sm:$0xff] %v4_v0 }

// kernel: tile.19
= control target key start
LH: loop header
LB: loop body
LE: loop exit
PB: predicated region body
PF: predicated region fallthrough
CT: control target
= control target key end

     0   :  { %s101_s10 = smov 44   ;;  %s102_s11 = smov 36   ;;  %vm3_vm0 = vcmask 31744   ;;  %vm9_vm1 = vcmask 392544   ;;  %vm15_vm2 = vcmask 359744   ;;  %vm21_vm3 = vcmask 326944   ;;  %s161_s0 = inlined_call_operand.vmem [shape: f32[12,4], index: 0, kind: input, shape index: {}]   ;;  %s162_s1 = inlined_call_operand.vmem [shape: f32[1,48], index: 1, kind: output, shape index: {}]  }
   0x1   :  { %v79_v0 = vld [vmem:[%s161_s0 + $0xb] sm:$0x1]   ;;  %v81_v1 = vld [vmem:[%s161_s0 + $0x9] sm:$0x1]   ;;  %v80_v2 = vld [vmem:[%s161_s0 + $0xa] sm:$0x1]  }
   0x2   :  { %7 = vrot.lane.b32.xlu0 %v79_v0, %s101_s10  ;;  %19 = vrot.lane.b32.xlu1 %v81_v1, %s102_s11  ;;  %v82_v3 = vld [vmem:[%s161_s0 + $0x8] sm:$0x1]   ;;  %s103_s16 = smov 40   ;;  %s104_s17 = smov 32   ;;  %v83_v4 = vld [vmem:[%s161_s0 + $0x7] sm:$0x1]  }
   0x3   :  { %v2_v5 = vld [vmem:[%s161_s0] sm:$0x1]   ;;  %v84_v6 = vld [vmem:[%s161_s0 + $0x6] sm:$0x1]   ;;  %s105_s24 = smov 28   ;;  %s106_s25 = smov 24  }
   0x4   :  { %4 = vst.msk [vmem:[#allocation0] sm:$0x1] %vm3_vm0, %v2_v5   ;;  %v85_v7 = vld [vmem:[%s161_s0 + $0x5] sm:$0x1]   ;;  %v86_v8 = vld [vmem:[%s161_s0 + $0x4] sm:$0x1]  }
   0x5   :  { %s107_s30 = smov 20   ;;  %s108_s2 = smov 16   ;;  %v87_v9 = vld [vmem:[%s161_s0 + $0x3] sm:$0x1]   ;;  %v88_v10 = vld [vmem:[%s161_s0 + $0x2] sm:$0x1]  }
   0x6   :  { %13 = vrot.lane.b32.xlu0 %v80_v2, %s103_s16  ;;  %25 = vrot.lane.b32.xlu1 %v82_v3, %s104_s17  ;;  %s109_s7 = smov 12   ;;  %s110_s8 = smov 8   ;;  %v89_v11 = vld [vmem:[%s161_s0 + $0x1] sm:$0x1]   ;;  %vm27_vm4 = vcmask 294144   ;;  %vm33_vm5 = vcmask 261344  }
   0x7   :  { %s111_s0 = smov 4   ;;  %vm39_vm6 = vcmask 228544   ;;  %vm45_vm7 = vcmask 195744   ;;  %vm51_vm8 = vcmask 162944   ;;  %vm57_vm9 = vcmask 130144  }
   0x8   :  { %vm63_vm10 = vcmask 97344   ;;  %vm69_vm11 = vcmask 64544  }
   0xa   :  { %31 = vrot.lane.b32.xlu0 %v83_v4, %s105_s24  ;;  %37 = vrot.lane.b32.xlu1 %v84_v6, %s106_s25 }
   0xe   :  { %43 = vrot.lane.b32.xlu0 %v85_v7, %s107_s30  ;;  %49 = vrot.lane.b32.xlu1 %v86_v8, %s108_s2 }
  0x12   :  { %55 = vrot.lane.b32.xlu0 %v87_v9, %s109_s7  ;;  %61 = vrot.lane.b32.xlu1 %v88_v10, %s110_s8 }
  0x16   :  { %67 = vrot.lane.b32.xlu0 %v89_v11, %s111_s0 }
  0x74   :  { %v8_v12 = vpop.permute.xlu0 %7   ;;  %v20_v13 = vpop.permute.xlu1 %19  }
  0x75   :  { %10 = vst.msk [vmem:[#allocation0] sm:$0x1] %vm9_vm1, %v8_v12  }
  0x78   :  { %v14_v14 = vpop.permute.xlu0 %13   ;;  %v26_v15 = vpop.permute.xlu1 %25  }
  0x79   :  { %16 = vst.msk [vmem:[#allocation0] sm:$0x1] %vm15_vm2, %v14_v14  }
  0x7a   :  { %22 = vst.msk [vmem:[#allocation0] sm:$0x1] %vm21_vm3, %v20_v13  }
  0x7b   :  { %28 = vst.msk [vmem:[#allocation0] sm:$0x1] %vm27_vm4, %v26_v15  }
  0x7c   :  { %v32_v16 = vpop.permute.xlu0 %31   ;;  %v38_v17 = vpop.permute.xlu1 %37  }
  0x7d   :  { %34 = vst.msk [vmem:[#allocation0] sm:$0x1] %vm33_vm5, %v32_v16  }
  0x7e   :  { %40 = vst.msk [vmem:[#allocation0] sm:$0x1] %vm39_vm6, %v38_v17  }
  0x80   :  { %v44_v18 = vpop.permute.xlu0 %43   ;;  %v50_v19 = vpop.permute.xlu1 %49  }
  0x81   :  { %46 = vst.msk [vmem:[#allocation0] sm:$0x1] %vm45_vm7, %v44_v18  }
  0x82   :  { %52 = vst.msk [vmem:[#allocation0] sm:$0x1] %vm51_vm8, %v50_v19  }
  0x84   :  { %v56_v20 = vpop.permute.xlu0 %55   ;;  %v62_v21 = vpop.permute.xlu1 %61  }
  0x85   :  { %58 = vst.msk [vmem:[#allocation0] sm:$0x1] %vm57_vm9, %v56_v20  }
  0x86   :  { %64 = vst.msk [vmem:[#allocation0] sm:$0x1] %vm63_vm10, %v62_v21  }
  0x88   :  { %v68_v22 = vpop.permute.xlu0 %67  }
  0x89   :  { %70 = vst.msk [vmem:[#allocation0] sm:$0x1] %vm69_vm11, %v68_v22  }
  0x90   :  { %v75_v23 = vld [vmem:[#allocation0] sm:$0x1] }
  0x91   :  { %78 = vst [vmem:[%s162_s1] sm:$0x1] %v75_v23 }

// kernel: upconv_concat_forward.1
= control target key start
LH: loop header
LB: loop body
LE: loop exit
PB: predicated region body
PF: predicated region fallthrough
CT: control target
= control target key end

     0   :  { %vm41_vm0 = vcmask 1043456   ;;  %v1884_v0 = vmov 0.0   ;;  %vm1885_vm1 = vmmov 0   ;;  %vm37_vm2 = vcmask 64512   ;;  %s1886_s9 = smov 64   ;;  %s2318_s1 = inlined_call_operand.vmem [shape: bf16[2,8,64], index: 1, kind: input, shape index: {}]   ;;  %s2319_s0 = inlined_call_operand.vmem [shape: bf16[16,8], index: 0, kind: input, shape index: {}]   ;;  %s2320_s2 = inlined_call_operand.vmem [shape: bf16[2,16,64], index: 2, kind: input, shape index: {}]   ;;  %s2321_s3 = inlined_call_operand.vmem [shape: bf16[3,128,56], index: 3, kind: input, shape index: {}]   ;;  %s2322_s5 = inlined_call_operand.vmem [shape: bf16[3,56,48], index: 5, kind: input, shape index: {}]   ;;  %s2323_s4 = inlined_call_operand.vmem [shape: f32[1,56], index: 4, kind: input, shape index: {}]   ;;  %s2324_s6 = inlined_call_operand.vmem [shape: f32[1,48], index: 6, kind: input, shape index: {}]   ;;  %s2325_s7 = inlined_call_operand.vmem [shape: f32[2,12,48], index: 7, kind: output, shape index: {}]  }
   0x1   :  { %1602 = vmatprep.subr.bf16.mxu1 %v1884_v0  ;;  %v31_v1 = vld [vmem:[%s2318_s1] sm:$0xf]  ;;  %1604 = vmatprep.mubr.msk.bf16.mxu1 %vm1885_vm1, %v1884_v0  ;;  %v1811_v5 = vld [vmem:[%s2321_s3 + $0x38] sm:$0xff]   ;;  %v1812_v6 = vld [vmem:[%s2321_s3 + $0x30] sm:$0xff]   ;;  %vm96_vm3 = vcmask 523264   ;;  %vm484_vm4 = vcmask 457728  }
   0x2   :  { %v43_v2 = vsel %vm41_vm0, %v31_v1, 0  ;;  %v1937_v3 = vld [vmem:[%s2319_s0] sm:$0xff]   ;;  %1628 = vmatprep.subr.bf16.mxu0 %v1884_v0  ;;  %1644 = vmatprep.mubr.msk.bf16.mxu0 %vm1885_vm1, %v1884_v0  ;;  %v1813_v7 = vld [vmem:[%s2321_s3 + $0x78] sm:$0xff]   ;;  %v1815_v8 = vld [vmem:[%s2321_s3 + $0x70] sm:$0xff]   ;;  %vm689_vm5 = vcmask 392192   ;;  %vm691_vm6 = vcmask 388096  }
   0x3   :  { %1603 = vmatpush3.bf16.msra.mxu1 %v43_v2  ;;  %v1810_v4 = vld [vmem:[%s2320_s2] sm:$0xff]   ;;  %1629 = vmatpush3.bf16.msra.mxu0 %v1811_v5  ;;  %v1814_v9 = vld [vmem:[%s2321_s3 + $0x28] sm:$0xff]   ;;  %v1818_v13 = vld [vmem:[%s2321_s3 + $0x18] sm:$0xff]  }
   0x4   :  { %1608 = vmatprep.subr.bf16.mxu1 %v1884_v0  ;;  %94 = vrot.lane.b32.xlu0 %v1810_v4, %s1886_s9  ;;  %v1817_v10 = vld [vmem:[%s2321_s3 + $0x68] sm:$0xff]   ;;  %v1816_v11 = vld [vmem:[%s2321_s3 + $0x20] sm:$0xff]   ;;  %v1821_v14 = vld [vmem:[%s2321_s3 + $0x58] sm:$0xff]  }
   0x5   :  { %1630 = vmatprep.subr.bf16.mxu0 %v1884_v0  ;;  %v1819_v12 = vld [vmem:[%s2321_s3 + $0x60] sm:$0xff]   ;;  %v1820_v15 = vld [vmem:[%s2321_s3 + $0x10] sm:$0xff]   ;;  %v1822_v16 = vld [vmem:[%s2321_s3 + $0x8] sm:$0xff]  }
   0x6   :  { %1605 = vmatmul.mubr.msk.bf16.vlgmr.msra.gmra.mxu1 %vm37_vm2, %v1937_v3  ;;  %v1823_v17 = vld [vmem:[%s2321_s3 + $0x50] sm:$0xff]   ;;  %v1824_v18 = vld [vmem:[%s2321_s3] sm:$0xff]   ;;  %v1825_v19 = vld [vmem:[%s2321_s3 + $0x48] sm:$0xff]  }
   0x7   :  { %1624 = vmatprep.mubr.msk.bf16.mxu1 %vm1885_vm1, %v1884_v0  ;;  %1609 = vmatpush3.bf16.msra.mxu1 %v1813_v7  ;;  %v1826_v20 = vld [vmem:[%s2321_s3 + $0x40] sm:$0xff]   ;;  %v1827_v31 = vld [vmem:[%s2321_s3 + $0xb8] sm:$0xff]   ;;  %v1828_v33 = vld [vmem:[%s2321_s3 + $0xb0] sm:$0xff]  }
   0x8   :  { %1610 = vmatprep.subr.bf16.mxu1 %v1884_v0  ;;  %1631 = vmatpush3.bf16.msra.mxu0 %v1812_v6  ;;  %v1829_v34 = vld [vmem:[%s2321_s3 + $0xa8] sm:$0xff]   ;;  %v1830_v35 = vld [vmem:[%s2321_s3 + $0xa0] sm:$0xff]   ;;  %v1831_v36 = vld [vmem:[%s2321_s3 + $0x98] sm:$0xff]  }
   0x9   :  { %1632 = vmatprep.subr.bf16.mxu0 %v1884_v0  ;;  %v1832_v37 = vld [vmem:[%s2321_s3 + $0x90] sm:$0xff]   ;;  %v1833_v38 = vld [vmem:[%s2321_s3 + $0x88] sm:$0xff]   ;;  %v1834_v39 = vld [vmem:[%s2321_s3 + $0x80] sm:$0xff]  }
   0xa   :  { %v1835_v41 = vld [vmem:[%s2322_s5 + $0x50] ss:$0 sps:$4 sm:$0xff]   ;;  %v1836_v43 = vld [vmem:[%s2322_s5 + $0x34] ss:$0 sps:$4 sm:$0xff]   ;;  %v1837_v45 = vld [vmem:[%s2322_s5 + $0x48] sm:$0xff]  }
   0xb   :  { %1611 = vmatpush3.bf16.msra.mxu1 %v1815_v8  ;;  %v634_v42 = vsel %vm41_vm0, %v1835_v41, 0  ;;  %v489_v44 = vsel %vm41_vm0, %v1836_v43, 0  ;;  %v1838_v46 = vld [vmem:[%s2322_s5 + $0x2c] sm:$0xff]   ;;  %v1839_v47 = vld [vmem:[%s2322_s5 + $0x40] sm:$0xff]   ;;  %v1841_v49 = vld [vmem:[%s2322_s5 + $0x38] sm:$0xff]  }
   0xc   :  { %1612 = vmatprep.subr.bf16.mxu1 %v1884_v0  ;;  %1633 = vmatpush3.bf16.msra.mxu0 %v1814_v9  ;;  %v1840_v48 = vld [vmem:[%s2322_s5 + $0x24] sm:$0xff]   ;;  %v1842_v50 = vld [vmem:[%s2322_s5 + $0x1c] sm:$0xff]  }
   0xd   :  { %1634 = vmatprep.subr.bf16.mxu0 %v1884_v0  ;;  %v1847_v51 = vld [vmem:[%s2320_s2 + $0x8] sm:$0xff]   ;;  %v2095_v63 = vld [vmem:[%s2323_s4] ss:$0 sm:$0xff] }
   0xe   :  { %748 = vrot.lane.b32.xlu0 %v1847_v51, %s1886_s9 }
   0xf   :  { %1613 = vmatpush3.bf16.msra.mxu1 %v1817_v10 }
  0x10   :  { %1614 = vmatprep.subr.bf16.mxu1 %v1884_v0  ;;  %1635 = vmatpush3.bf16.msra.mxu0 %v1816_v11 }
  0x11   :  { %1636 = vmatprep.subr.bf16.mxu0 %v1884_v0 }
  0x13   :  { %1615 = vmatpush3.bf16.msra.mxu1 %v1819_v12 }
  0x14   :  { %1616 = vmatprep.subr.bf16.mxu1 %v1884_v0  ;;  %1637 = vmatpush3.bf16.msra.mxu0 %v1818_v13 }
  0x15   :  { %1638 = vmatprep.subr.bf16.mxu0 %v1884_v0 }
  0x17   :  { %1617 = vmatpush3.bf16.msra.mxu1 %v1821_v14  ;;  %v1843_v14 = vld [vmem:[%s2322_s5 + $0x18] ss:$0 sps:$4 sm:$0xff]  }
  0x18   :  { %1618 = vmatprep.subr.bf16.mxu1 %v1884_v0  ;;  %1639 = vmatpush3.bf16.msra.mxu0 %v1820_v15 }
  0x19   :  { %1640 = vmatprep.subr.bf16.mxu0 %v1884_v0 }
  0x1b   :  { %1619 = vmatpush3.bf16.msra.mxu1 %v1823_v17 }
  0x1c   :  { %1641 = vmatpush3.bf16.msra.mxu0 %v1822_v16  ;;  %1620 = vmatprep.subr.bf16.mxu1 %v1884_v0 }
  0x1d   :  { %1642 = vmatprep.subr.bf16.mxu0 %v1884_v0 }
  0x1f   :  { %1621 = vmatpush3.bf16.msra.mxu1 %v1825_v19  ;;  %v1844_v19 = vld [vmem:[%s2322_s5 + $0x10] sm:$0xff]  }
  0x20   :  { %1643 = vmatpush3.bf16.msra.mxu0 %v1824_v18  ;;  %1622 = vmatprep.subr.bf16.mxu1 %v1884_v0  ;;  %v556_v18 = vsel %vm41_vm0, %v1843_v14, 0  ;;  %v1868_v14 = vld [vmem:[%s2321_s3 + $0x98] sm:$0xff]  }
  0x21   :  { %1668 = vmatprep.subr.bf16.mxu0 %v1884_v0 }
  0x23   :  { %1623 = vmatpush3.bf16.msra.mxu1 %v1826_v20  ;;  %v1845_v20 = vld [vmem:[%s2322_s5 + $0x8] sm:$0xff]  }
  0x24   :  { %1648 = vmatprep.subr.bf16.mxu1 %v1884_v0 }
  0x76   :  { %v95_v24 = vpop.permute.xlu0 %94 }
  0xc6   :  { %v79_v21 = vpop.f32.mrf.mxu1 }
  0xc8   :  { %v1606_v22 = vpop.f32.mrf.mxu1 }
  0xc9   :  { %v1422_v22 = vld [vmem:[%s2318_s1 + $0x4] sm:$0xf] }
  0xca   :  { %v82_v23 = vpop.f32.mrf.mxu1 }
  0xcb   :  { %v86_v25 = vpack.c.bf16 %v82_v23, %v79_v21  ;;  %v1846_v21 = vld [vmem:[%s2322_s5] sm:$0xff]   ;;  %v696_v23 = vsel %vm41_vm0, %v1422_v22, 0 }
  0xcc   :  { %v1607_v26 = vpop.f32.mrf.mxu1 }
  0xcd   :  { %v99_v27 = vsel %vm96_vm3, %v86_v25, %v95_v24  ;;  %v1848_v24 = vld [vmem:[%s2321_s3 + $0x38] sm:$0xff]   ;;  %v1849_v25 = vld [vmem:[%s2321_s3 + $0x30] sm:$0xff]  }
  0xce   :  { %v136_v28 = vshll.u32 %v99_v27, 16  ;;  %1645 = vmatmul.mubr.bf16.vlgmr.msra.gmra.mxu0 %v99_v27  ;;  %v134_v29 = vshrl.u32 %v99_v27, 16  ;;  %v337_v40 = vrot.slane %v99_v27, 1  ;;  %v1850_v26 = vld [vmem:[%s2321_s3 + $0x78] sm:$0xff]   ;;  %v1852_v27 = vld [vmem:[%s2321_s3 + $0x70] sm:$0xff]  }
  0xcf   :  { %1676 = vmatprep.mubr.msk.bf16.mxu0 %vm1885_vm1, %v1884_v0  ;;  %1669 = vmatpush3.bf16.msra.mxu0 %v489_v44 }
  0xd0   :  { %v138_v30 = vrot.slane %v136_v28, 1  ;;  %1670 = vmatprep.subr.bf16.mxu0 %v1884_v0  ;;  %v1853_v28 = vld [vmem:[%s2321_s3 + $0x20] sm:$0xff]  }
  0xd2   :  { %v139_v32 = vor.u32 %v138_v30, %v134_v29  ;;  %v1854_v29 = vld [vmem:[%s2321_s3 + $0x68] sm:$0xff]   ;;  %v1855_v30 = vld [vmem:[%s2321_s3 + $0x18] sm:$0xff]  }
  0xd3   :  { %1671 = vmatpush3.bf16.msra.mxu0 %v1838_v46 }
  0xd4   :  { %1625 = vmatmul.mubr.bf16.vlgmr.msra.gmra.mxu1 %v139_v32  ;;  %1672 = vmatprep.subr.bf16.mxu0 %v1884_v0  ;;  %v1857_v32 = vld [vmem:[%s2321_s3 + $0x10] sm:$0xff]  }
  0xd5   :  { %1649 = vmatpush3.bf16.msra.mxu1 %v1827_v31  ;;  %1664 = vmatprep.mubr.msk.bf16.mxu1 %vm1885_vm1, %v1884_v0  ;;  %v1856_v31 = vld [vmem:[%s2321_s3 + $0x60] sm:$0xff]  }
  0xd6   :  { %1650 = vmatprep.subr.bf16.mxu1 %v1884_v0 }
  0xd7   :  { %1673 = vmatpush3.bf16.msra.mxu0 %v1840_v48 }
  0xd8   :  { %1674 = vmatprep.subr.bf16.mxu0 %v1884_v0 }
  0xd9   :  { %1651 = vmatpush3.bf16.msra.mxu1 %v1828_v33  ;;  %v1858_v33 = vld [vmem:[%s2321_s3 + $0x58] sm:$0xff]  }
  0xda   :  { %1652 = vmatprep.subr.bf16.mxu1 %v1884_v0 }
  0xdb   :  { %1675 = vmatpush3.bf16.msra.mxu0 %v1842_v50 }
  0xdc   :  { %1680 = vmatprep.subr.bf16.mxu0 %v1884_v0 }
  0xdd   :  { %1653 = vmatpush3.bf16.msra.mxu1 %v1829_v34  ;;  %v1859_v34 = vld [vmem:[%s2321_s3 + $0x8] sm:$0xff]  }
  0xde   :  { %1654 = vmatprep.subr.bf16.mxu1 %v1884_v0 }
  0xe1   :  { %1655 = vmatpush3.bf16.msra.mxu1 %v1830_v35  ;;  %v1860_v35 = vld [vmem:[%s2321_s3 + $0x50] sm:$0xff]  }
  0xe2   :  { %1656 = vmatprep.subr.bf16.mxu1 %v1884_v0 }
  0xe5   :  { %1657 = vmatpush3.bf16.msra.mxu1 %v1831_v36  ;;  %v1861_v36 = vld [vmem:[%s2321_s3] sm:$0xff]  }
  0xe6   :  { %1658 = vmatprep.subr.bf16.mxu1 %v1884_v0 }
  0xe9   :  { %1659 = vmatpush3.bf16.msra.mxu1 %v1832_v37  ;;  %v1862_v37 = vld [vmem:[%s2321_s3 + $0x48] sm:$0xff]  }
  0xea   :  { %1660 = vmatprep.subr.bf16.mxu1 %v1884_v0 }
  0xed   :  { %1661 = vmatpush3.bf16.msra.mxu1 %v1833_v38  ;;  %v1863_v38 = vld [vmem:[%s2321_s3 + $0x40] sm:$0xff]  }
  0xee   :  { %1662 = vmatprep.subr.bf16.mxu1 %v1884_v0 }
  0xf1   :  { %1663 = vmatpush3.bf16.msra.mxu1 %v1834_v39 }
  0xf2   :  { %1692 = vmatprep.subr.bf16.mxu1 %v1884_v0 }
  0xf4   :  { %1665 = vmatmul.mubr.bf16.vlgmr.msra.gmra.mxu1 %v337_v40 }
  0xf5   :  { %1700 = vmatprep.mubr.msk.bf16.mxu1 %vm1885_vm1, %v1884_v0  ;;  %1693 = vmatpush3.bf16.msra.mxu1 %v634_v42 }
  0xf6   :  { %1694 = vmatprep.subr.bf16.mxu1 %v1884_v0 }
  0xf9   :  { %1695 = vmatpush3.bf16.msra.mxu1 %v1837_v45 }
  0xfa   :  { %1696 = vmatprep.subr.bf16.mxu1 %v1884_v0 }
  0xfd   :  { %1697 = vmatpush3.bf16.msra.mxu1 %v1839_v47 }
  0xfe   :  { %1698 = vmatprep.subr.bf16.mxu1 %v1884_v0 }
 0x101   :  { %1699 = vmatpush3.bf16.msra.mxu1 %v1841_v49  ;;  %v2201_v49 = vld [vmem:[%s2324_s6] ss:$0 sm:$0xff] }
 0x102   :  { %1730 = vmatprep.subr.bf16.mxu1 %v1884_v0 }
 0x18e   :  { %v312_v52 = vpop.f32.mrf.mxu0 }
 0x190   :  { %v1646_v53 = vpop.f32.mrf.mxu0 }
 0x192   :  { %v315_v54 = vpop.f32.mrf.mxu0 }
 0x194   :  { %v223_v55 = vpop.f32.mrf.mxu1  ;;  %v1647_v56 = vpop.f32.mrf.mxu0 }
 0x195   :  { %v313_v60 = vadd.f32 %v312_v52, %v223_v55 }
 0x196   :  { %v1626_v57 = vpop.f32.mrf.mxu1 }
 0x198   :  { %v226_v58 = vpop.f32.mrf.mxu1 }
 0x199   :  { %v316_v2 = vadd.f32 %v315_v54, %v226_v58 }
 0x19a   :  { %v1627_v59 = vpop.f32.mrf.mxu1 }
 0x1b4   :  { %v421_v61 = vpop.f32.mrf.mxu1 }
 0x1b5   :  { %v428_v62 = vadd.f32 %v421_v61, %v313_v60 }
 0x1b6   :  { %v1666_v1 = vpop.f32.mrf.mxu1 }
 0x1b7   :  { %v436_v5 = vadd.f32 %v2095_v63, %v428_v62  ;;  %v749_v1 = vpop.permute.xlu0 %748 }
 0x1b8   :  { %v424_v4 = vpop.f32.mrf.mxu1 }
 0x1b9   :  { %v429_v6 = vadd.f32 %v424_v4, %v316_v2  ;;  %v438_v9 = vmax.f32 %v436_v5, 0.0 }
 0x1ba   :  { %v1667_v7 = vpop.f32.mrf.mxu1 }
 0x1bb   :  { %v437_v8 = vadd.f32 %v2095_v63, %v429_v6 }
 0x1bd   :  { %v439_v10 = vmax.f32 %v437_v8, 0.0 }
 0x1bf   :  { %v440_v11 = vpack.c.bf16 %v439_v10, %v438_v9  ;;  %v1864_v9 = vld [vmem:[%s2321_s3 + $0xb8] sm:$0xff]  }
 0x1c1   :  { %v459_v12 = vshll.u32 %v440_v11, 16  ;;  %v608_v13 = vrot.slane %v440_v11, 1  ;;  %v457_v15 = vshrl.u32 %v440_v11, 16 }
 0x1c3   :  { %v461_v16 = vrot.slane %v459_v12, 1  ;;  %1701 = vmatmul.mubr.msk.bf16.vlgmr.msra.gmra.mxu1 %vm484_vm4, %v608_v13  ;;  %v1866_v12 = vld [vmem:[%s2321_s3 + $0xa8] sm:$0xff]   ;;  %v1867_v13 = vld [vmem:[%s2321_s3 + $0xa0] sm:$0xff]  }
 0x1c4   :  { %1746 = vmatprep.mubr.msk.bf16.mxu1 %vm1885_vm1, %v1884_v0  ;;  %1731 = vmatpush3.bf16.msra.mxu1 %v1848_v24  ;;  %v1875_v24 = vld [vmem:[%s2322_s5 + $0x2c] sm:$0xff]  }
 0x1c5   :  { %v462_v17 = vor.u32 %v461_v16, %v457_v15  ;;  %1732 = vmatprep.subr.bf16.mxu1 %v1884_v0  ;;  %v1869_v15 = vld [vmem:[%s2321_s3 + $0x90] sm:$0xff]   ;;  %v1870_v16 = vld [vmem:[%s2321_s3 + $0x88] sm:$0xff]  }
 0x1c7   :  { %1677 = vmatmul.mubr.msk.bf16.vlgmr.msra.gmra.mxu0 %vm484_vm4, %v462_v17  ;;  %v1871_v17 = vld [vmem:[%s2321_s3 + $0x80] sm:$0xff]  }
 0x1c8   :  { %1681 = vmatpush3.bf16.msra.mxu0 %v556_v18  ;;  %1688 = vmatprep.mubr.msk.bf16.mxu0 %vm1885_vm1, %v1884_v0 }
 0x1c9   :  { %1682 = vmatprep.subr.bf16.mxu0 %v1884_v0  ;;  %1733 = vmatpush3.bf16.msra.mxu1 %v1849_v25  ;;  %v1876_v25 = vld [vmem:[%s2322_s5 + $0x40] sm:$0xff]  }
 0x1ca   :  { %1734 = vmatprep.subr.bf16.mxu1 %v1884_v0 }
 0x1cc   :  { %1683 = vmatpush3.bf16.msra.mxu0 %v1844_v19  ;;  %v1872_v19 = vld [vmem:[%s2322_s5 + $0x50] ss:$0 sps:$4 sm:$0xff]  }
 0x1cd   :  { %1684 = vmatprep.subr.bf16.mxu0 %v1884_v0 }
 0x1d0   :  { %1685 = vmatpush3.bf16.msra.mxu0 %v1845_v20  ;;  %v1276_v20 = vsel %vm41_vm0, %v1872_v19, 0 }
 0x1d1   :  { %1686 = vmatprep.subr.bf16.mxu0 %v1884_v0 }
 0x1d4   :  { %1687 = vmatpush3.bf16.msra.mxu0 %v1846_v21  ;;  %v1873_v21 = vld [vmem:[%s2322_s5 + $0x34] ss:$0 sps:$4 sm:$0xff]  }
 0x1d5   :  { %1704 = vmatprep.subr.bf16.mxu0 %v1884_v0  ;;  %v1132_v22 = vsel %vm41_vm0, %v1873_v21, 0 }
 0x1d7   :  { %1689 = vmatmul.mubr.msk.bf16.vlgmr.msra.gmra.mxu0 %vm484_vm4, %v440_v11  ;;  %v1865_v11 = vld [vmem:[%s2321_s3 + $0xb0] sm:$0xff]  }
 0x1d8   :  { %1705 = vmatpush3.bf16.msra.mxu0 %v696_v23  ;;  %1706 = vmatprep.mubr.msk.bf16.mxu0 %vm1885_vm1, %v1884_v0  ;;  %v1874_v23 = vld [vmem:[%s2322_s5 + $0x48] sm:$0xff]  }
 0x1d9   :  { %1710 = vmatprep.subr.bf16.mxu0 %v1884_v0 }
 0x1df   :  { %1707 = vmatmul.mubr.msk.bf16.vlgmr.msra.gmra.mxu0 %vm37_vm2, %v1937_v3  ;;  %v1851_v3 = vld [vmem:[%s2321_s3 + $0x28] sm:$0xff]  }
 0x1e0   :  { %1726 = vmatprep.mubr.msk.bf16.mxu0 %vm1885_vm1, %v1884_v0  ;;  %1711 = vmatpush3.bf16.msra.mxu0 %v1850_v26  ;;  %v1877_v26 = vld [vmem:[%s2322_s5 + $0x24] sm:$0xff]  }
 0x1e1   :  { %1712 = vmatprep.subr.bf16.mxu0 %v1884_v0  ;;  %1735 = vmatpush3.bf16.msra.mxu1 %v1851_v3  ;;  %v1878_v3 = vld [vmem:[%s2322_s5 + $0x38] sm:$0xff]  }
 0x1e2   :  { %1736 = vmatprep.subr.bf16.mxu1 %v1884_v0 }
 0x1e4   :  { %1713 = vmatpush3.bf16.msra.mxu0 %v1852_v27  ;;  %v1879_v27 = vld [vmem:[%s2322_s5 + $0x1c] sm:$0xff]  }
 0x1e5   :  { %1714 = vmatprep.subr.bf16.mxu0 %v1884_v0  ;;  %1737 = vmatpush3.bf16.msra.mxu1 %v1853_v28 }
 0x1e6   :  { %1738 = vmatprep.subr.bf16.mxu1 %v1884_v0 }
 0x1e8   :  { %1715 = vmatpush3.bf16.msra.mxu0 %v1854_v29 }
 0x1e9   :  { %1716 = vmatprep.subr.bf16.mxu0 %v1884_v0  ;;  %1739 = vmatpush3.bf16.msra.mxu1 %v1855_v30 }
 0x1ea   :  { %1740 = vmatprep.subr.bf16.mxu1 %v1884_v0 }
 0x1ec   :  { %1717 = vmatpush3.bf16.msra.mxu0 %v1856_v31 }
 0x1ed   :  { %1718 = vmatprep.subr.bf16.mxu0 %v1884_v0  ;;  %1741 = vmatpush3.bf16.msra.mxu1 %v1857_v32 }
 0x1ee   :  { %1742 = vmatprep.subr.bf16.mxu1 %v1884_v0 }
 0x1f0   :  { %1719 = vmatpush3.bf16.msra.mxu0 %v1858_v33 }
 0x1f1   :  { %1720 = vmatprep.subr.bf16.mxu0 %v1884_v0  ;;  %1743 = vmatpush3.bf16.msra.mxu1 %v1859_v34 }
 0x1f2   :  { %1744 = vmatprep.subr.bf16.mxu1 %v1884_v0 }
 0x1f4   :  { %1721 = vmatpush3.bf16.msra.mxu0 %v1860_v35 }
 0x1f5   :  { %1722 = vmatprep.subr.bf16.mxu0 %v1884_v0  ;;  %1745 = vmatpush3.bf16.msra.mxu1 %v1861_v36 }
 0x1f6   :  { %1770 = vmatprep.subr.bf16.mxu1 %v1884_v0 }
 0x1f8   :  { %1723 = vmatpush3.bf16.msra.mxu0 %v1862_v37 }
 0x1f9   :  { %1724 = vmatprep.subr.bf16.mxu0 %v1884_v0 }
 0x1fc   :  { %1725 = vmatpush3.bf16.msra.mxu0 %v1863_v38 }
 0x1fd   :  { %1750 = vmatprep.subr.bf16.mxu0 %v1884_v0 }
 0x283   :  { %v670_v39 = vpop.f32.mrf.mxu1 }
 0x285   :  { %v1702_v40 = vpop.f32.mrf.mxu1 }
 0x287   :  { %v525_v41 = vpop.f32.mrf.mxu0  ;;  %v673_v42 = vpop.f32.mrf.mxu1 }
 0x289   :  { %v1678_v43 = vpop.f32.mrf.mxu0  ;;  %v1703_v44 = vpop.f32.mrf.mxu1 }
 0x28b   :  { %v528_v45 = vpop.f32.mrf.mxu0 }
 0x28d   :  { %v1679_v46 = vpop.f32.mrf.mxu0 }
 0x297   :  { %v592_v47 = vpop.f32.mrf.mxu0 }
 0x298   :  { %v593_v48 = vadd.f32 %v592_v47, %v525_v41 }
 0x299   :  { %v1690_v50 = vpop.f32.mrf.mxu0 }
 0x29a   :  { %v677_v51 = vadd.f32 %v670_v39, %v593_v48 }
 0x29b   :  { %v595_v52 = vpop.f32.mrf.mxu0 }
 0x29c   :  { %v685_v53 = vadd.f32 %v2201_v49, %v677_v51  ;;  %v596_v54 = vadd.f32 %v595_v52, %v528_v45  ;;  %v1880_v52 = vld [vmem:[%s2322_s5 + $0x18] ss:$0 sps:$4 sm:$0xff]  }
 0x29d   :  { %v1691_v55 = vpop.f32.mrf.mxu0 }
 0x29e   :  { %v687_v56 = vmax.f32 %v685_v53, 0.0  ;;  %v678_v57 = vadd.f32 %v673_v42, %v596_v54 }
 0x29f   :  { %v732_v58 = vpop.f32.mrf.mxu0 }
 0x2a0   :  { %690 = vst.msk [vmem:[%s2325_s7] sm:$0xff] %vm689_vm5, %v687_v56  ;;  %v686_v59 = vadd.f32 %v2201_v49, %v678_v57  ;;  %v1199_v56 = vsel %vm41_vm0, %v1880_v52, 0  ;;  %v1882_v57 = vld [vmem:[%s2322_s5 + $0x8] sm:$0xff]  }
 0x2a1   :  { %v1708_v60 = vpop.f32.mrf.mxu0 }
 0x2a2   :  { %v688_v61 = vmax.f32 %v686_v59, 0.0 }
 0x2a3   :  { %v735_v62 = vpop.f32.mrf.mxu0 }
 0x2a4   :  { %692 = vst.msk [vmem:[%s2325_s7 + $0x8] sm:$0xf] %vm691_vm6, %v688_v61  ;;  %v739_v2 = vpack.c.bf16 %v735_v62, %v732_v58  ;;  %v1883_v58 = vld [vmem:[%s2322_s5] sm:$0xff]  }
 0x2a5   :  { %v1709_v4 = vpop.f32.mrf.mxu0 }
 0x2a6   :  { %v752_v5 = vsel %vm96_vm3, %v739_v2, %v749_v1 }
 0x2a7   :  { %v788_v6 = vshll.u32 %v752_v5, 16  ;;  %1747 = vmatmul.mubr.bf16.vlgmr.msra.gmra.mxu1 %v752_v5  ;;  %v786_v7 = vshrl.u32 %v752_v5, 16  ;;  %v988_v18 = vrot.slane %v752_v5, 1 }
 0x2a8   :  { %1778 = vmatprep.mubr.msk.bf16.mxu1 %vm1885_vm1, %v1884_v0  ;;  %1771 = vmatpush3.bf16.msra.mxu1 %v1132_v22 }
 0x2a9   :  { %v790_v8 = vrot.slane %v788_v6, 1  ;;  %1772 = vmatprep.subr.bf16.mxu1 %v1884_v0 }
 0x2ab   :  { %v791_v10 = vor.u32 %v790_v8, %v786_v7 }
 0x2ac   :  { %1773 = vmatpush3.bf16.msra.mxu1 %v1875_v24 }
 0x2ad   :  { %1727 = vmatmul.mubr.bf16.vlgmr.msra.gmra.mxu0 %v791_v10  ;;  %1774 = vmatprep.subr.bf16.mxu1 %v1884_v0 }
 0x2ae   :  { %1751 = vmatpush3.bf16.msra.mxu0 %v1864_v9  ;;  %1766 = vmatprep.mubr.msk.bf16.mxu0 %vm1885_vm1, %v1884_v0 }
 0x2af   :  { %1752 = vmatprep.subr.bf16.mxu0 %v1884_v0 }
 0x2b0   :  { %1775 = vmatpush3.bf16.msra.mxu1 %v1877_v26 }
 0x2b1   :  { %1776 = vmatprep.subr.bf16.mxu1 %v1884_v0 }
 0x2b2   :  { %1753 = vmatpush3.bf16.msra.mxu0 %v1865_v11 }
 0x2b3   :  { %1754 = vmatprep.subr.bf16.mxu0 %v1884_v0 }
 0x2b4   :  { %1777 = vmatpush3.bf16.msra.mxu1 %v1879_v27 }
 0x2b5   :  { %1782 = vmatprep.subr.bf16.mxu1 %v1884_v0 }
 0x2b6   :  { %1755 = vmatpush3.bf16.msra.mxu0 %v1866_v12 }
 0x2b7   :  { %1756 = vmatprep.subr.bf16.mxu0 %v1884_v0 }
 0x2ba   :  { %1757 = vmatpush3.bf16.msra.mxu0 %v1867_v13 }
 0x2bb   :  { %1758 = vmatprep.subr.bf16.mxu0 %v1884_v0 }
 0x2be   :  { %1759 = vmatpush3.bf16.msra.mxu0 %v1868_v14 }
 0x2bf   :  { %1760 = vmatprep.subr.bf16.mxu0 %v1884_v0 }
 0x2c2   :  { %1761 = vmatpush3.bf16.msra.mxu0 %v1869_v15 }
 0x2c3   :  { %1762 = vmatprep.subr.bf16.mxu0 %v1884_v0 }
 0x2c6   :  { %1763 = vmatpush3.bf16.msra.mxu0 %v1870_v16 }
 0x2c7   :  { %1764 = vmatprep.subr.bf16.mxu0 %v1884_v0 }
 0x2ca   :  { %1765 = vmatpush3.bf16.msra.mxu0 %v1871_v17 }
 0x2cb   :  { %1794 = vmatprep.subr.bf16.mxu0 %v1884_v0 }
 0x2cd   :  { %1767 = vmatmul.mubr.bf16.vlgmr.msra.gmra.mxu0 %v988_v18 }
 0x2ce   :  { %1802 = vmatprep.mubr.msk.bf16.mxu0 %vm1885_vm1, %v1884_v0  ;;  %1795 = vmatpush3.bf16.msra.mxu0 %v1276_v20 }
 0x2cf   :  { %1796 = vmatprep.subr.bf16.mxu0 %v1884_v0 }
 0x2d2   :  { %1797 = vmatpush3.bf16.msra.mxu0 %v1874_v23 }
 0x2d3   :  { %1798 = vmatprep.subr.bf16.mxu0 %v1884_v0 }
 0x2d6   :  { %1799 = vmatpush3.bf16.msra.mxu0 %v1876_v25 }
 0x2d7   :  { %1800 = vmatprep.subr.bf16.mxu0 %v1884_v0 }
 0x2da   :  { %1801 = vmatpush3.bf16.msra.mxu0 %v1878_v3 }
 0x367   :  { %v964_v28 = vpop.f32.mrf.mxu1 }
 0x369   :  { %v1748_v29 = vpop.f32.mrf.mxu1 }
 0x36b   :  { %v967_v30 = vpop.f32.mrf.mxu1 }
 0x36d   :  { %v875_v31 = vpop.f32.mrf.mxu0  ;;  %v1749_v32 = vpop.f32.mrf.mxu1 }
 0x36e   :  { %v965_v36 = vadd.f32 %v964_v28, %v875_v31 }
 0x36f   :  { %v1728_v33 = vpop.f32.mrf.mxu0 }
 0x371   :  { %v878_v34 = vpop.f32.mrf.mxu0 }
 0x372   :  { %v968_v40 = vadd.f32 %v967_v30, %v878_v34 }
 0x373   :  { %v1729_v35 = vpop.f32.mrf.mxu0 }
 0x38d   :  { %v1072_v37 = vpop.f32.mrf.mxu0 }
 0x38e   :  { %v1079_v38 = vadd.f32 %v1072_v37, %v965_v36 }
 0x38f   :  { %v1768_v39 = vpop.f32.mrf.mxu0 }
 0x390   :  { %v1081_v42 = vadd.f32 %v2095_v63, %v1079_v38 }
 0x391   :  { %v1075_v41 = vpop.f32.mrf.mxu0 }
 0x392   :  { %v1080_v43 = vadd.f32 %v1075_v41, %v968_v40  ;;  %v1083_v46 = vmax.f32 %v1081_v42, 0.0 }
 0x393   :  { %v1769_v44 = vpop.f32.mrf.mxu0 }
 0x394   :  { %v1082_v45 = vadd.f32 %v2095_v63, %v1080_v43  ;;  %v1881_v63 = vld [vmem:[%s2322_s5 + $0x10] sm:$0xff]  }
 0x396   :  { %v1084_v47 = vmax.f32 %v1082_v45, 0.0 }
 0x398   :  { %v1085_v48 = vpack.c.bf16 %v1084_v47, %v1083_v46 }
 0x39a   :  { %v1103_v50 = vshll.u32 %v1085_v48, 16  ;;  %v1250_v51 = vrot.slane %v1085_v48, 1  ;;  %v1101_v53 = vshrl.u32 %v1085_v48, 16 }
 0x39c   :  { %v1105_v54 = vrot.slane %v1103_v50, 1  ;;  %1803 = vmatmul.mubr.msk.bf16.vlgmr.msra.gmra.mxu0 %vm484_vm4, %v1250_v51 }
 0x39e   :  { %v1106_v55 = vor.u32 %v1105_v54, %v1101_v53 }
 0x3a0   :  { %1779 = vmatmul.mubr.msk.bf16.vlgmr.msra.gmra.mxu1 %vm484_vm4, %v1106_v55 }
 0x3a1   :  { %1783 = vmatpush3.bf16.msra.mxu1 %v1199_v56  ;;  %1790 = vmatprep.mubr.msk.bf16.mxu1 %vm1885_vm1, %v1884_v0 }
 0x3a2   :  { %1784 = vmatprep.subr.bf16.mxu1 %v1884_v0 }
 0x3a5   :  { %1785 = vmatpush3.bf16.msra.mxu1 %v1881_v63 }
 0x3a6   :  { %1786 = vmatprep.subr.bf16.mxu1 %v1884_v0 }
 0x3a9   :  { %1787 = vmatpush3.bf16.msra.mxu1 %v1882_v57 }
 0x3aa   :  { %1788 = vmatprep.subr.bf16.mxu1 %v1884_v0 }
 0x3ad   :  { %1789 = vmatpush3.bf16.msra.mxu1 %v1883_v58 }
 0x3b0   :  { %1791 = vmatmul.mubr.msk.bf16.vlgmr.msra.gmra.mxu1 %vm484_vm4, %v1085_v48 }
 0x45c   :  { %v1312_v59 = vpop.f32.mrf.mxu0 }
 0x45e   :  { %v1804_v60 = vpop.f32.mrf.mxu0 }
 0x460   :  { %v1168_v61 = vpop.f32.mrf.mxu1  ;;  %v1315_v62 = vpop.f32.mrf.mxu0 }
 0x462   :  { %v1780_v1 = vpop.f32.mrf.mxu1  ;;  %v1805_v2 = vpop.f32.mrf.mxu0 }
 0x464   :  { %v1171_v4 = vpop.f32.mrf.mxu1 }
 0x466   :  { %v1781_v5 = vpop.f32.mrf.mxu1 }
 0x470   :  { %v1235_v6 = vpop.f32.mrf.mxu1 }
 0x471   :  { %v1236_v7 = vadd.f32 %v1235_v6, %v1168_v61 }
 0x472   :  { %v1792_v8 = vpop.f32.mrf.mxu1 }
 0x473   :  { %v1319_v9 = vadd.f32 %v1312_v59, %v1236_v7 }
 0x474   :  { %v1238_v10 = vpop.f32.mrf.mxu1 }
 0x475   :  { %v1321_v11 = vadd.f32 %v2201_v49, %v1319_v9  ;;  %v1239_v12 = vadd.f32 %v1238_v10, %v1171_v4 }
 0x476   :  { %v1793_v0 = vpop.f32.mrf.mxu1 }
 0x477   :  { %v1323_v13 = vmax.f32 %v1321_v11, 0.0  ;;  %v1320_v14 = vadd.f32 %v1315_v62, %v1239_v12 }
 0x479   :  { %1512 = vst.msk [vmem:[%s2325_s7 + $0x10] sm:$0xff] %vm689_vm5, %v1323_v13  ;;  %v1322_v15 = vadd.f32 %v2201_v49, %v1320_v14 }
 0x47b   :  { %v1324_v16 = vmax.f32 %v1322_v15, 0.0 }
 0x47d   :  { %1513 = vst.msk [vmem:[%s2325_s7 + $0x18] sm:$0xf] %vm691_vm6, %v1324_v16 }

</bundles_post_ra>
